<compile_context>
chip_gen: v7x
topology: tpu7x:2x2x1
jax: 0.10.0
libtpu: 0.0.40
codegen_flags: <defaults>
</compile_context>

<pallas_src>
import functools

import jax
import jax.numpy as jnp
from jax.experimental import pallas as pl
from jax.experimental.pallas import tpu as pltpu

_MAX_TM = 1024        # lane-tile cap (tiles >=512 already hit HBM roofline)
_NEG = -1.0e30        # sentinel pad: relu(scale*_NEG + shift) == 0 for scale > 0


def _round_up(x, m):
    return (x + m - 1) // m * m


def _detect_vmem_bytes():
    try:
        cap = getattr(pltpu.get_tpu_info(), "vmem_capacity_bytes", None)
    except Exception:
        cap = None
    return int(cap) if cap else 64 * 1024 * 1024   # assume v7x (smallest VMEM)


_TPU_VMEM = _detect_vmem_bytes()
_VMEM_BUDGET = int(_TPU_VMEM * 0.6)                          # tile-sizing budget
_VMEM_LIMIT = int(min(_TPU_VMEM - (8 << 20), _VMEM_BUDGET + (16 << 20)))


def _pick_tile(m, k, c, in_bytes=2, out_bytes=2):
    """Lane tile (multiple of 128) + padded M for the conv passes.
    Budget: double-buffered bf16 patch tile + output tile + resident weight."""
    per_col = 2 * (k * in_bytes + c * out_bytes)
    cap = max(128, (_VMEM_BUDGET - 2 * c * k * 2) // max(per_col, 1))
    tm = max(128, min(_MAX_TM, (cap // 128) * 128, _round_up(m, 128)))
    if m > 128:                       # keep >=2 tiles of *real* work when possible
        tm = min(tm, _round_up(-(-m // 2), 128))
    mp = max(_round_up(m, tm), 2 * tm)   # always >=2 grid steps (v7x megacore)
    return tm, mp


def _affine_tile(mp, c):
    """Lane tile for the BN-affine pass: per-step block is tiny at small C, so
    merge as much M per step as the budget allows, but keep >=2 grid steps."""
    cap = max(128, _VMEM_BUDGET // max(2 * c * 4, 1))
    tm = max(128, min(mp, (cap // 128) * 128))
    while mp % tm:
        tm -= 128
    if tm == mp and mp >= 256 and mp % 256 == 0:
        tm = mp // 2                  # give both v7x TensorCores a step
    return tm


# ----------------------------------------------------------------------------
# Pallas kernel 1: per-K-row affine (folded upstream BN) -> activation ->
#                  conv-as-matmul (f32 accum) -> per-tile [sum, sumsq]
# ----------------------------------------------------------------------------
def _conv_bn_stats_kernel(xT_ref, w_ref, scale_ref, shift_ref, y_ref, stats_ref,
                          *, act):
    x = xT_ref[...].astype(jnp.float32)                  # (K, TM) bf16 -> f32
    x = x * scale_ref[...] + shift_ref[...]              # folded BN (encoder: 1, 0)
    if act == "leaky":                                   # LeakyReLU(0.2); act(0)=0
        x = jnp.where(x >= 0, x, 0.2 * x)
    elif act == "relu":                                  # decoder pre-activation
        x = jnp.maximum(x, 0.0)
    # Operands upcast to f32: interpret/XLA:CPU has no bf16xbf16=f32 dot, and
    # on TPU this pass is DMA-bound so the f32 MXU path is not the bottleneck.
    y = jnp.dot(w_ref[...].astype(jnp.float32), x,
                preferred_element_type=jnp.float32)      # (C, TM) f32 accum
    y_ref[...] = y.astype(y_ref.dtype)                   # bf16 HBM stream
    s = jnp.sum(y, axis=1, keepdims=True)                # (C, 1)
    ss = jnp.sum(y * y, axis=1, keepdims=True)           # (C, 1)
    stats_ref[...] = jnp.concatenate([s, ss], axis=1)[None]   # single store


def conv_bn_stats(xT, w, scale_rows, shift_rows, *, act, tm):
    """xT: (K, Mp) bf16 patches; w: (C, K) bf16; scale/shift: (K, 1) f32.
    Returns y_raw (C, Mp) bf16 and per-tile stats (nt, C, 2) = [sum, sumsq]."""
    K, Mp = xT.shape
    C = w.shape[0]
    nt = Mp // tm
    kernel = functools.partial(_conv_bn_stats_kernel, act=act)
    return pl.pallas_call(
        kernel,
        out_shape=(jax.ShapeDtypeStruct((C, Mp), jnp.bfloat16),
                   jax.ShapeDtypeStruct((nt, C, 2), jnp.float32)),
        grid=(nt,),
        in_specs=[pl.BlockSpec((K, tm), lambda i: (0, i)),
                  pl.BlockSpec((C, K), lambda i: (0, 0)),
                  pl.BlockSpec((K, 1), lambda i: (0, 0)),
                  pl.BlockSpec((K, 1), lambda i: (0, 0))],
        out_specs=(pl.BlockSpec((C, tm), lambda i: (0, i)),
                   pl.BlockSpec((1, C, 2), lambda i: (i, 0, 0))),
        compiler_params=pltpu.CompilerParams(
            dimension_semantics=("parallel",),
            vmem_limit_bytes=_VMEM_LIMIT),
    )(xT, w, scale_rows, shift_rows)


# ----------------------------------------------------------------------------
# Pallas kernel 2: folded BatchNorm (y*scale + shift) for the decoder output
# ----------------------------------------------------------------------------
def _affine_kernel(y_ref, scale_ref, shift_ref, o_ref):
    y = y_ref[...].astype(jnp.float32) * scale_ref[...] + shift_ref[...]
    o_ref[...] = y.astype(o_ref.dtype)


def bn_affine(y, scale, shift):
    C, Mp = y.shape
    tm = _affine_tile(Mp, C)
    nt = Mp // tm
    return pl.pallas_call(
        _affine_kernel,
        out_shape=jax.ShapeDtypeStruct((C, Mp), jnp.bfloat16),
        grid=(nt,),
        in_specs=[pl.BlockSpec((C, tm), lambda i: (0, i)),
                  pl.BlockSpec((C, 1), lambda i: (0, 0)),
                  pl.BlockSpec((C, 1), lambda i: (0, 0))],
        out_specs=pl.BlockSpec((C, tm), lambda i: (0, i)),
        compiler_params=pltpu.CompilerParams(
            dimension_semantics=("parallel",),
            vmem_limit_bytes=_VMEM_LIMIT),
    )(y, scale.reshape(C, 1).astype(jnp.float32),
      shift.reshape(C, 1).astype(jnp.float32))


# ----------------------------------------------------------------------------
# XLA glue: transposed-layout im2col, BN stat finalize, sub-pixel weights
# ----------------------------------------------------------------------------
def im2col_T(x_nchw, k, stride, pad, pad_value=0.0):
    """Patches in transposed layout (C*k*k, N*Ho*Wo), dtype preserved.
    Row (K) order = (C, kh, kw), column (M) order = (N, Ho, Wo)."""
    N, C, H, W = x_nchw.shape
    xp = jnp.pad(x_nchw, ((0, 0), (0, 0), (pad, pad), (pad, pad)),
                 constant_values=pad_value)
    Ho = (H + 2 * pad - k) // stride + 1
    Wo = (W + 2 * pad - k) // stride + 1
    cols = []
    for kh in range(k):
        for kw in range(k):
            cols.append(xp[:, :, kh:kh + stride * Ho:stride,
                           kw:kw + stride * Wo:stride])    # (N, C, Ho, Wo)
    p = jnp.stack(cols, axis=2)                   # (N, C, k*k, Ho, Wo)
    p = p.transpose(1, 2, 0, 3, 4)                # (C, k*k, N, Ho, Wo)
    return p.reshape(C * k * k, N * Ho * Wo), N, Ho, Wo


def _bn_scale_shift(stats, count, gamma, beta, eps=1e-5):
    """stats: (nt, C, 2) per-tile [sum, sumsq]; returns per-channel scale/shift
    such that BN(y) == y*scale + shift (training-mode batch stats, biased var)."""
    s = jnp.sum(stats[:, :, 0], axis=0)
    ss = jnp.sum(stats[:, :, 1], axis=0)
    mean = s / count
    var = jnp.maximum(ss / count - mean * mean, 0.0)   # guard fp cancellation
    # TODO(synk): for very large batch*spatial, switch to mean-shifted /
    #             Welford-style per-tile stats to avoid cancellation.
    scale = gamma * jax.lax.rsqrt(var + eps)
    shift = beta - mean * scale
    return scale, shift


def _subpixel_weight(w_dec):
    """Re-express ConvTranspose2d(k=4, s=2, p=1) weight (Cin, Cout, 4, 4) as a
    (4*Cout, Cin*3*3) matrix applied to 3x3 windows of y padded by 1:
    output z[2i+di, 2j+dj] = W_sub[(di,dj,co), :] . window(y_pad, i, j)."""
    Cin, Cout = w_dec.shape[0], w_dec.shape[1]
    taps = {0: ((0, 3), (1, 1)), 1: ((1, 2), (2, 0))}   # phase d -> ((wr, kh), ...)
    w = jnp.zeros((Cin, 3, 3, 2, 2, Cout), w_dec.dtype)
    for di, rtaps in taps.items():
        for dj, ctaps in taps.items():
            for wr, kh in rtaps:
                for wc, kw in ctaps:
                    w = w.at[:, wr, wc, di, dj, :].set(w_dec[:, :, kh, kw])
    return w.reshape(Cin * 9, 4 * Cout).T               # (4*Cout, Cin*9)


# ----------------------------------------------------------------------------
# EncoderDecoder forward (position=MIDDLE, sub_block=None, dropout=False)
# ----------------------------------------------------------------------------
def encoder_decoder_forward(x, params, eps=1e-5):
    x = x.astype(jnp.float32)
    N = x.shape[0]

    # ---------------- Encoder: LeakyReLU(0.2) -> Conv2d(4,2,1) -> BN --------
    patches_e, _, Ho, Wo = im2col_T(x.astype(jnp.bfloat16), k=4, stride=2, pad=1)
    Ke = patches_e.shape[0]
    Me = N * Ho * Wo
    w_e = params["w_enc"].astype(jnp.bfloat16)
    w_e = w_e.reshape(w_e.shape[0], -1)                         # (Ce, Cin*16)
    Ce = w_e.shape[0]
    tm_e, Mpe = _pick_tile(Me, Ke, Ce)
    patches_e = jnp.pad(patches_e, ((0, 0), (0, Mpe - Me)))     # zeros; leaky(0)=0
    ones = jnp.ones((Ke, 1), jnp.float32)
    zeros = jnp.zeros((Ke, 1), jnp.float32)
    # b_enc intentionally unused: training-mode BN cancels the conv bias.
    y_raw, st_e = conv_bn_stats(patches_e, w_e, ones, zeros, act="leaky", tm=tm_e)
    scale_e, shift_e = _bn_scale_shift(st_e, float(Me),
                                       params["gamma_enc"], params["beta_enc"],
                                       eps)

    # -------- Decoder: ReLU -> ConvTranspose2d(4,2,1) -> BN  (sub-pixel) ----
    # Encoder BN + decoder ReLU are folded into this pass as a per-K-row
    # affine, so patches come from the *raw* encoder conv output.  Halo and
    # M-padding positions use the _NEG sentinel so relu(scale*_NEG+shift)==0,
    # reproducing zero-padding of the normalized+ReLU'd activation
    # (requires scale_enc > 0, i.e. gamma_enc > 0 — true for default BN init).
    y_nchw = y_raw[:, :Me].reshape(Ce, N, Ho, Wo).transpose(1, 0, 2, 3)
    patches_d, _, _, _ = im2col_T(y_nchw, k=3, stride=1, pad=1, pad_value=_NEG)
    Kd = patches_d.shape[0]                                     # Ce * 9
    Md = N * Ho * Wo
    w_d = _subpixel_weight(params["w_dec"]).astype(jnp.bfloat16)  # (4*Cd, Ce*9)
    Cd = params["w_dec"].shape[1]
    tm_d, Mpd = _pick_tile(Md, Kd, 4 * Cd)
    patches_d = jnp.pad(patches_d, ((0, 0), (0, Mpd - Md)), constant_values=_NEG)
    scale_rows = jnp.repeat(scale_e, 9).reshape(Kd, 1).astype(jnp.float32)
    shift_rows = jnp.repeat(shift_e, 9).reshape(Kd, 1).astype(jnp.float32)
    # b_dec intentionally unused (BN cancels it).
    z_raw, st_d = conv_bn_stats(patches_d, w_d, scale_rows, shift_rows,
                                act="relu", tm=tm_d)
    # Combine the 4 sub-pixel phases per channel for BatchNorm statistics.
    st_d = st_d.reshape(st_d.shape[0], 4, Cd, 2).sum(axis=1)    # (nt, Cd, 2)
    scale_d, shift_d = _bn_scale_shift(st_d, float(4 * Md),
                                       params["gamma_dec"], params["beta_dec"],
                                       eps)
    z_norm = bn_affine(z_raw, jnp.tile(scale_d, 4), jnp.tile(shift_d, 4))[:, :Md]

    # Interleave the 4 sub-pixel phases back into (N, Cd, 2*Ho, 2*Wo).
    # TODO(synk): fuse this de-interleave into the affine output index map.
    z = z_norm.reshape(2, 2, Cd, N, Ho, Wo).transpose(3, 2, 4, 0, 5, 1)
    z = z.reshape(N, Cd, 2 * Ho, 2 * Wo).astype(jnp.float32)

    # ------------------- position != OUTER: concat([x, z], dim=1) -----------
    return jnp.concatenate([x, z], axis=1)


# ----------------------------------------------------------------------------
if __name__ == "__main__":
    # EncoderDecoder(in_enc=4, out_enc=8, in_dec=8, out_dec=4,
    #                dropout=False, sub_block=None, position=MIDDLE)
    N, in_enc, H, W = 2, 4, 16, 16
    out_enc, in_dec, out_dec = 8, 8, 4

    key = jax.random.PRNGKey(0)
    ks = jax.random.split(key, 5)
    x = jax.random.normal(ks[0], (N, in_enc, H, W), jnp.float32)

    params = {
        # Conv2d(in_enc, out_enc, 4): weight (out, in, 4, 4), bias (out,)
        "w_enc": jax.random.normal(ks[1], (out_enc, in_enc, 4, 4), jnp.float32) * 0.1,
        "b_enc": jax.random.normal(ks[2], (out_enc,), jnp.float32) * 0.1,   # cancelled by BN
        # BatchNorm2d(out_enc) default affine init
        "gamma_enc": jnp.ones((out_enc,), jnp.float32),
        "beta_enc": jnp.zeros((out_enc,), jnp.float32),
        # ConvTranspose2d(in_dec, out_dec, 4): weight (in, out, 4, 4), bias (out,)
        "w_dec": jax.random.normal(ks[3], (in_dec, out_dec, 4, 4), jnp.float32) * 0.1,
        "b_dec": jax.random.normal(ks[4], (out_dec,), jnp.float32) * 0.1,   # cancelled by BN
        # BatchNorm2d(out_dec) default affine init
        "gamma_dec": jnp.ones((out_dec,), jnp.float32),
        "beta_dec": jnp.zeros((out_dec,), jnp.float32),
    }

    out = jax.jit(encoder_decoder_forward)(x, params)
    out = jax.block_until_ready(out)
    assert out.shape == (N, in_enc + out_dec, H, W), out.shape
    assert out.dtype == jnp.float32
    assert bool(jnp.all(jnp.isfinite(out)))
    print("KERNEL_OK")
</pallas_src>

<mosaic_0001>
module attributes {stable_mosaic.version = 11 : i64} {
  func.func @_conv_bn_stats_kernel(%arg0: i32, %arg1: memref<64x128xbf16, #tpu.memory_space<vmem>>, %arg2: memref<8x64xbf16, #tpu.memory_space<vmem>>, %arg3: memref<64x1xf32, #tpu.memory_space<vmem>>, %arg4: memref<64x1xf32, #tpu.memory_space<vmem>>, %arg5: memref<8x128xbf16, #tpu.memory_space<vmem>>, %arg6: memref<1x8x2xf32, #tpu.memory_space<vmem>>) attributes {dimension_semantics = [#tpu.dimension_semantics<parallel>], iteration_bounds = array<i64: 2>, scalar_prefetch = 0 : i64, scratch_operands = 0 : i64, tpu.core_type = #tpu.core_type<tc>, window_params = [{transform_indices = @transform_0, window_bounds = array<i64: 64, 128>}, {pipeline_mode = #tpu.pipeline_mode<synchronous>, transform_indices = @transform_1, window_bounds = array<i64: 8, 64>}, {pipeline_mode = #tpu.pipeline_mode<synchronous>, transform_indices = @transform_2, window_bounds = array<i64: 64, 1>}, {pipeline_mode = #tpu.pipeline_mode<synchronous>, transform_indices = @transform_3, window_bounds = array<i64: 64, 1>}, {transform_indices = @transform_4, window_bounds = array<i64: 8, 128>}, {transform_indices = @transform_5, window_bounds = array<i64: 1, 8, 2>}]} {
    %c0 = arith.constant 0 : index
    %c0_0 = arith.constant 0 : index
    %0 = vector.load %arg1[%c0, %c0_0] : memref<64x128xbf16, #tpu.memory_space<vmem>>, vector<64x128xbf16>
    %1 = arith.extf %0 : vector<64x128xbf16> to vector<64x128xf32>
    %c0_1 = arith.constant 0 : index
    %c0_2 = arith.constant 0 : index
    %2 = vector.load %arg3[%c0_1, %c0_2] : memref<64x1xf32, #tpu.memory_space<vmem>>, vector<64x1xf32>
    %3 = vector.broadcast %2 : vector<64x1xf32> to vector<64x128xf32>
    %4 = arith.mulf %1, %3 : vector<64x128xf32>
    %c0_3 = arith.constant 0 : index
    %c0_4 = arith.constant 0 : index
    %5 = vector.load %arg4[%c0_3, %c0_4] : memref<64x1xf32, #tpu.memory_space<vmem>>, vector<64x1xf32>
    %6 = vector.broadcast %5 : vector<64x1xf32> to vector<64x128xf32>
    %7 = arith.addf %4, %6 : vector<64x128xf32>
    %cst = arith.constant 0.000000e+00 : f32
    %8 = vector.broadcast %cst : f32 to vector<64x128xf32>
    %9 = arith.cmpf oge, %7, %8 : vector<64x128xf32>
    %cst_5 = arith.constant 2.000000e-01 : f32
    %10 = vector.broadcast %cst_5 : f32 to vector<64x128xf32>
    %11 = arith.mulf %10, %7 : vector<64x128xf32>
    %12 = arith.select %9, %7, %11 : vector<64x128xi1>, vector<64x128xf32>
    %c0_6 = arith.constant 0 : index
    %c0_7 = arith.constant 0 : index
    %13 = vector.load %arg2[%c0_6, %c0_7] : memref<8x64xbf16, #tpu.memory_space<vmem>>, vector<8x64xbf16>
    %14 = arith.extf %13 : vector<8x64xbf16> to vector<8x64xf32>
    %cst_8 = arith.constant dense<0.000000e+00> : vector<8x128xf32>
    %15 = tpu.matmul %14, %12, %cst_8 {dimension_numbers = #tpu.dot_dimension_numbers<[1], [0], [0], [1], [0, 0, 1, 1], [], []>} : vector<8x64xf32>, vector<64x128xf32>, vector<8x128xf32> -> vector<8x128xf32>
    %16 = arith.truncf %15 : vector<8x128xf32> to vector<8x128xbf16>
    %c0_9 = arith.constant 0 : index
    %c0_10 = arith.constant 0 : index
    %17 = vector.load %arg5[%c0_9, %c0_10] : memref<8x128xbf16, #tpu.memory_space<vmem>>, vector<8x128xbf16>
    tpu.vector_store %arg5[%c0_9, %c0_10], %16 {strides = array<i32>} : memref<8x128xbf16, #tpu.memory_space<vmem>>, vector<8x128xbf16>,
    %cst_11 = arith.constant dense<0.000000e+00> : vector<8xf32>
    %18 = vector.multi_reduction <add>, %15, %cst_11 [1] : vector<8x128xf32> to vector<8xf32>
    %19 = vector.shape_cast %18 : vector<8xf32> to vector<8x1xf32>
    %20 = arith.mulf %15, %15 : vector<8x128xf32>
    %cst_12 = arith.constant dense<0.000000e+00> : vector<8xf32>
    %21 = vector.multi_reduction <add>, %20, %cst_12 [1] : vector<8x128xf32> to vector<8xf32>
    %22 = vector.shape_cast %21 : vector<8xf32> to vector<8x1xf32>
    %23 = tpu.concatenate %19, %22 in 1 : vector<8x1xf32>, vector<8x1xf32> -> vector<8x2xf32>
    %24 = vector.shape_cast %23 : vector<8x2xf32> to vector<1x8x2xf32>
    %c0_13 = arith.constant 0 : index
    %c0_14 = arith.constant 0 : index
    %c0_15 = arith.constant 0 : index
    %25 = vector.load %arg6[%c0_13, %c0_14, %c0_15] : memref<1x8x2xf32, #tpu.memory_space<vmem>>, vector<1x8x2xf32>
    tpu.vector_store %arg6[%c0_13, %c0_14, %c0_15], %24 {strides = array<i32>} : memref<1x8x2xf32, #tpu.memory_space<vmem>>, vector<1x8x2xf32>,
    return
  }
  func.func @transform_0(%arg0: i32) -> (i32, i32) {
    %c0_i32 = arith.constant 0 : i32
    %c0_i32_0 = arith.constant 0 : i32
    return %c0_i32, %arg0 : i32, i32
  }
  func.func @transform_1(%arg0: i32) -> (i32, i32) {
    %c0_i32 = arith.constant 0 : i32
    %c0_i32_0 = arith.constant 0 : i32
    %c0_i32_1 = arith.constant 0 : i32
    return %c0_i32, %c0_i32_0 : i32, i32
  }
  func.func @transform_2(%arg0: i32) -> (i32, i32) {
    %c0_i32 = arith.constant 0 : i32
    %c0_i32_0 = arith.constant 0 : i32
    %c0_i32_1 = arith.constant 0 : i32
    return %c0_i32, %c0_i32_0 : i32, i32
  }
  func.func @transform_3(%arg0: i32) -> (i32, i32) {
    %c0_i32 = arith.constant 0 : i32
    %c0_i32_0 = arith.constant 0 : i32
    %c0_i32_1 = arith.constant 0 : i32
    return %c0_i32, %c0_i32_0 : i32, i32
  }
  func.func @transform_4(%arg0: i32) -> (i32, i32) {
    %c0_i32 = arith.constant 0 : i32
    %c0_i32_0 = arith.constant 0 : i32
    return %c0_i32, %arg0 : i32, i32
  }
  func.func @transform_5(%arg0: i32) -> (i32, i32, i32) {
    %c0_i32 = arith.constant 0 : i32
    %c0_i32_0 = arith.constant 0 : i32
    %c0_i32_1 = arith.constant 0 : i32
    return %arg0, %c0_i32, %c0_i32_0 : i32, i32, i32
  }
}

module attributes {stable_mosaic.version = 11 : i64} {
  func.func @_conv_bn_stats_kernel(%arg0: i32, %arg1: memref<72x128xbf16, #tpu.memory_space<vmem>>, %arg2: memref<16x72xbf16, #tpu.memory_space<vmem>>, %arg3: memref<72x1xf32, #tpu.memory_space<vmem>>, %arg4: memref<72x1xf32, #tpu.memory_space<vmem>>, %arg5: memref<16x128xbf16, #tpu.memory_space<vmem>>, %arg6: memref<1x16x2xf32, #tpu.memory_space<vmem>>) attributes {dimension_semantics = [#tpu.dimension_semantics<parallel>], iteration_bounds = array<i64: 2>, scalar_prefetch = 0 : i64, scratch_operands = 0 : i64, tpu.core_type = #tpu.core_type<tc>, window_params = [{transform_indices = @transform_0, window_bounds = array<i64: 72, 128>}, {pipeline_mode = #tpu.pipeline_mode<synchronous>, transform_indices = @transform_1, window_bounds = array<i64: 16, 72>}, {pipeline_mode = #tpu.pipeline_mode<synchronous>, transform_indices = @transform_2, window_bounds = array<i64: 72, 1>}, {pipeline_mode = #tpu.pipeline_mode<synchronous>, transform_indices = @transform_3, window_bounds = array<i64: 72, 1>}, {transform_indices = @transform_4, window_bounds = array<i64: 16, 128>}, {transform_indices = @transform_5, window_bounds = array<i64: 1, 16, 2>}]} {
    %c0 = arith.constant 0 : index
    %c0_0 = arith.constant 0 : index
    %0 = vector.load %arg1[%c0, %c0_0] : memref<72x128xbf16, #tpu.memory_space<vmem>>, vector<72x128xbf16>
    %1 = arith.extf %0 : vector<72x128xbf16> to vector<72x128xf32>
    %c0_1 = arith.constant 0 : index
    %c0_2 = arith.constant 0 : index
    %2 = vector.load %arg3[%c0_1, %c0_2] : memref<72x1xf32, #tpu.memory_space<vmem>>, vector<72x1xf32>
    %3 = vector.broadcast %2 : vector<72x1xf32> to vector<72x128xf32>
    %4 = arith.mulf %1, %3 : vector<72x128xf32>
    %c0_3 = arith.constant 0 : index
    %c0_4 = arith.constant 0 : index
    %5 = vector.load %arg4[%c0_3, %c0_4] : memref<72x1xf32, #tpu.memory_space<vmem>>, vector<72x1xf32>
    %6 = vector.broadcast %5 : vector<72x1xf32> to vector<72x128xf32>
    %7 = arith.addf %4, %6 : vector<72x128xf32>
    %cst = arith.constant 0.000000e+00 : f32
    %8 = vector.broadcast %cst : f32 to vector<72x128xf32>
    %9 = arith.maximumf %7, %8 : vector<72x128xf32>
    %c0_5 = arith.constant 0 : index
    %c0_6 = arith.constant 0 : index
    %10 = vector.load %arg2[%c0_5, %c0_6] : memref<16x72xbf16, #tpu.memory_space<vmem>>, vector<16x72xbf16>
    %11 = arith.extf %10 : vector<16x72xbf16> to vector<16x72xf32>
    %cst_7 = arith.constant dense<0.000000e+00> : vector<16x128xf32>
    %12 = tpu.matmul %11, %9, %cst_7 {dimension_numbers = #tpu.dot_dimension_numbers<[1], [0], [0], [1], [0, 0, 1, 1], [], []>} : vector<16x72xf32>, vector<72x128xf32>, vector<16x128xf32> -> vector<16x128xf32>
    %13 = arith.truncf %12 : vector<16x128xf32> to vector<16x128xbf16>
    %c0_8 = arith.constant 0 : index
    %c0_9 = arith.constant 0 : index
    %14 = vector.load %arg5[%c0_8, %c0_9] : memref<16x128xbf16, #tpu.memory_space<vmem>>, vector<16x128xbf16>
    tpu.vector_store %arg5[%c0_8, %c0_9], %13 {strides = array<i32>} : memref<16x128xbf16, #tpu.memory_space<vmem>>, vector<16x128xbf16>,
    %cst_10 = arith.constant dense<0.000000e+00> : vector<16xf32>
    %15 = vector.multi_reduction <add>, %12, %cst_10 [1] : vector<16x128xf32> to vector<16xf32>
    %16 = vector.shape_cast %15 : vector<16xf32> to vector<16x1xf32>
    %17 = arith.mulf %12, %12 : vector<16x128xf32>
    %cst_11 = arith.constant dense<0.000000e+00> : vector<16xf32>
    %18 = vector.multi_reduction <add>, %17, %cst_11 [1] : vector<16x128xf32> to vector<16xf32>
    %19 = vector.shape_cast %18 : vector<16xf32> to vector<16x1xf32>
    %20 = tpu.concatenate %16, %19 in 1 : vector<16x1xf32>, vector<16x1xf32> -> vector<16x2xf32>
    %21 = vector.shape_cast %20 : vector<16x2xf32> to vector<1x16x2xf32>
    %c0_12 = arith.constant 0 : index
    %c0_13 = arith.constant 0 : index
    %c0_14 = arith.constant 0 : index
    %22 = vector.load %arg6[%c0_12, %c0_13, %c0_14] : memref<1x16x2xf32, #tpu.memory_space<vmem>>, vector<1x16x2xf32>
    tpu.vector_store %arg6[%c0_12, %c0_13, %c0_14], %21 {strides = array<i32>} : memref<1x16x2xf32, #tpu.memory_space<vmem>>, vector<1x16x2xf32>,
    return
  }
  func.func @transform_0(%arg0: i32) -> (i32, i32) {
    %c0_i32 = arith.constant 0 : i32
    %c0_i32_0 = arith.constant 0 : i32
    return %c0_i32, %arg0 : i32, i32
  }
  func.func @transform_1(%arg0: i32) -> (i32, i32) {
    %c0_i32 = arith.constant 0 : i32
    %c0_i32_0 = arith.constant 0 : i32
    %c0_i32_1 = arith.constant 0 : i32
    return %c0_i32, %c0_i32_0 : i32, i32
  }
  func.func @transform_2(%arg0: i32) -> (i32, i32) {
    %c0_i32 = arith.constant 0 : i32
    %c0_i32_0 = arith.constant 0 : i32
    %c0_i32_1 = arith.constant 0 : i32
    return %c0_i32, %c0_i32_0 : i32, i32
  }
  func.func @transform_3(%arg0: i32) -> (i32, i32) {
    %c0_i32 = arith.constant 0 : i32
    %c0_i32_0 = arith.constant 0 : i32
    %c0_i32_1 = arith.constant 0 : i32
    return %c0_i32, %c0_i32_0 : i32, i32
  }
  func.func @transform_4(%arg0: i32) -> (i32, i32) {
    %c0_i32 = arith.constant 0 : i32
    %c0_i32_0 = arith.constant 0 : i32
    return %c0_i32, %arg0 : i32, i32
  }
  func.func @transform_5(%arg0: i32) -> (i32, i32, i32) {
    %c0_i32 = arith.constant 0 : i32
    %c0_i32_0 = arith.constant 0 : i32
    %c0_i32_1 = arith.constant 0 : i32
    return %arg0, %c0_i32, %c0_i32_0 : i32, i32, i32
  }
}

module attributes {stable_mosaic.version = 11 : i64} {
  func.func @_affine_kernel(%arg0: i32, %arg1: memref<16x128xbf16, #tpu.memory_space<vmem>>, %arg2: memref<16x1xf32, #tpu.memory_space<vmem>>, %arg3: memref<16x1xf32, #tpu.memory_space<vmem>>, %arg4: memref<16x128xbf16, #tpu.memory_space<vmem>>) attributes {dimension_semantics = [#tpu.dimension_semantics<parallel>], iteration_bounds = array<i64: 2>, scalar_prefetch = 0 : i64, scratch_operands = 0 : i64, tpu.core_type = #tpu.core_type<tc>, window_params = [{transform_indices = @transform_0, window_bounds = array<i64: 16, 128>}, {pipeline_mode = #tpu.pipeline_mode<synchronous>, transform_indices = @transform_1, window_bounds = array<i64: 16, 1>}, {pipeline_mode = #tpu.pipeline_mode<synchronous>, transform_indices = @transform_2, window_bounds = array<i64: 16, 1>}, {transform_indices = @transform_3, window_bounds = array<i64: 16, 128>}]} {
    %c0 = arith.constant 0 : index
    %c0_0 = arith.constant 0 : index
    %0 = vector.load %arg1[%c0, %c0_0] : memref<16x128xbf16, #tpu.memory_space<vmem>>, vector<16x128xbf16>
    %1 = arith.extf %0 : vector<16x128xbf16> to vector<16x128xf32>
    %c0_1 = arith.constant 0 : index
    %c0_2 = arith.constant 0 : index
    %2 = vector.load %arg2[%c0_1, %c0_2] : memref<16x1xf32, #tpu.memory_space<vmem>>, vector<16x1xf32>
    %3 = vector.broadcast %2 : vector<16x1xf32> to vector<16x128xf32>
    %4 = arith.mulf %1, %3 : vector<16x128xf32>
    %c0_3 = arith.constant 0 : index
    %c0_4 = arith.constant 0 : index
    %5 = vector.load %arg3[%c0_3, %c0_4] : memref<16x1xf32, #tpu.memory_space<vmem>>, vector<16x1xf32>
    %6 = vector.broadcast %5 : vector<16x1xf32> to vector<16x128xf32>
    %7 = arith.addf %4, %6 : vector<16x128xf32>
    %8 = arith.truncf %7 : vector<16x128xf32> to vector<16x128xbf16>
    %c0_5 = arith.constant 0 : index
    %c0_6 = arith.constant 0 : index
    %9 = vector.load %arg4[%c0_5, %c0_6] : memref<16x128xbf16, #tpu.memory_space<vmem>>, vector<16x128xbf16>
    tpu.vector_store %arg4[%c0_5, %c0_6], %8 {strides = array<i32>} : memref<16x128xbf16, #tpu.memory_space<vmem>>, vector<16x128xbf16>,
    return
  }
  func.func @transform_0(%arg0: i32) -> (i32, i32) {
    %c0_i32 = arith.constant 0 : i32
    %c0_i32_0 = arith.constant 0 : i32
    return %c0_i32, %arg0 : i32, i32
  }
  func.func @transform_1(%arg0: i32) -> (i32, i32) {
    %c0_i32 = arith.constant 0 : i32
    %c0_i32_0 = arith.constant 0 : i32
    %c0_i32_1 = arith.constant 0 : i32
    return %c0_i32, %c0_i32_0 : i32, i32
  }
  func.func @transform_2(%arg0: i32) -> (i32, i32) {
    %c0_i32 = arith.constant 0 : i32
    %c0_i32_0 = arith.constant 0 : i32
    %c0_i32_1 = arith.constant 0 : i32
    return %c0_i32, %c0_i32_0 : i32, i32
  }
  func.func @transform_3(%arg0: i32) -> (i32, i32) {
    %c0_i32 = arith.constant 0 : i32
    %c0_i32_0 = arith.constant 0 : i32
    return %c0_i32, %arg0 : i32, i32
  }
}

</mosaic_0001>

<bundles_post_ra>
// kernel: encoder_decoder_forward.3
= control target key start
LH: loop header
LB: loop body
LE: loop exit
PB: predicated region body
PF: predicated region fallthrough
CT: control target
= control target key end

     0   :  { %s792_s18 = smov 0   ;;  %s794_s19 = smov 0   ;;  %s910_s0 = inlined_call_operand.vmem [shape: bf16[64,256], index: 0, kind: input, shape index: {}]   ;;  %s911_s1 = inlined_call_operand.vmem [shape: bf16[8,64], index: 1, kind: input, shape index: {}]   ;;  %s912_s2 = inlined_call_operand.vmem [shape: f32[64,1], index: 2, kind: input, shape index: {}]   ;;  %s913_s3 = inlined_call_operand.vmem [shape: f32[64,1], index: 3, kind: input, shape index: {}]   ;;  %s914_s4 = inlined_call_operand.vmem [shape: bf16[8,256], index: 4, kind: output, shape index: {0}]   ;;  %s915_s5 = inlined_call_operand.vmem [shape: f32[2,8,2], index: 5, kind: output, shape index: {1}]  }
   0x1   :  { %s796_s20 = smov 0  }
   0x2 LB: > { %s632_s21 = sadd.s32 4294967295, %s756_s20   ;;  %s809_s22 = sadd.s32 1, %s756_s20   ;;  %s756_s20 = sphi %s796_s20, %s918_s20   ;;  %s752_s19 = sphi %s794_s19, %s917_s19   ;;  %s748_s18 = sphi %s792_s18, %s916_s18  }
   0x3   : > { %s20_s23 = ssub.s32 %s756_s20, %s809_s22  ;;  %s23_s24 = sadd.s32 1, %s752_s19 }
   0x4   : > { %p21_p0 = scmp.eq.s32.totalorder %s20_s23, 0  ;;  %p30_p1 = scmp.ne.s32.totalorder %s752_s19, %s748_s18 }
   0x5   : > { %p31_p2 = scmp.eq.s32.totalorder %s756_s20, 0  ;;  %p635_p4 = scmp.ge.s32.totalorder %s756_s20, 2 }
   0x6   : > { %s818_s25 = scalar_select %p21_p0, %s752_s19, %s23_s24  }
   0x7   : > { %p32_p3 = por %p31_p2, %p30_p1  ;;  %180 = sbr.rel (%p635_p4) target bundleno = 23 (0x17), region = 28 }
   0xe   : > { %183 = sbr.rel (!%p32_p3) target bundleno = 23 (0x17), region = 32  ;;  %s185_s26 = sand.u32 (%p32_p3), 1, %s752_s19  }
   0xf   : > { %s637_s27 = sshll.u32 (%p32_p3), %s756_s20, 2  ;;  %s636_s28 = sshll.u32 (%p32_p3), %s185_s26, 5 }
  0x10   : > { %s189_s6 = scalar_lea.vmem (%p32_p3), %s910_s0, %s637_s27  ;;  %s187_s7 = scalar_lea.vmem (%p32_p3), [#allocation2], %s636_s28 }
  0x11   : > { %v205_v0 = vld [vmem:[%s189_s6] sm:$0xf] (%p32_p3)  ;;  %v207_v1 = vld [vmem:[%s189_s6 + $0x8] sm:$0xf] (%p32_p3)  ;;  %v209_v2 = vld [vmem:[%s189_s6 + $0x10] sm:$0xf] (%p32_p3) }
  0x12   : > { %206 = vst [vmem:[%s187_s7] sm:$0xf] (%p32_p3), %v205_v0  ;;  %208 = vst [vmem:[%s187_s7 + $0x4] sm:$0xf] (%p32_p3), %v207_v1  ;;  %v211_v3 = vld [vmem:[%s189_s6 + $0x18] sm:$0xf] (%p32_p3) }
  0x13   : > { %v213_v4 = vld [vmem:[%s189_s6 + $0x20] sm:$0xf] (%p32_p3)  ;;  %210 = vst [vmem:[%s187_s7 + $0x8] sm:$0xf] (%p32_p3), %v209_v2  ;;  %212 = vst [vmem:[%s187_s7 + $0xc] sm:$0xf] (%p32_p3), %v211_v3 }
  0x14   : > { %214 = vst [vmem:[%s187_s7 + $0x10] sm:$0xf] (%p32_p3), %v213_v4  ;;  %v215_v5 = vld [vmem:[%s189_s6 + $0x28] sm:$0xf] (%p32_p3)  ;;  %v217_v6 = vld [vmem:[%s189_s6 + $0x30] sm:$0xf] (%p32_p3) }
  0x15   : > { %v219_v7 = vld [vmem:[%s189_s6 + $0x38] sm:$0xf]  ;;  %216 = vst [vmem:[%s187_s7 + $0x14] sm:$0xf] %v215_v5  ;;  %218 = vst [vmem:[%s187_s7 + $0x18] sm:$0xf] %v217_v6 }
  0x16   : > { %220 = vst [vmem:[%s187_s7 + $0x1c] sm:$0xf] %v219_v7 }
  0x17 PF: > { %p638_p5 = scmp.ge.s32.totalorder %s756_s20, 1  ;;  %p258_p6 = scmp.lt.s32.totalorder %s756_s20, 3 }
  0x19   : > { %p259_p7 = pnand %p638_p5, %p258_p6 }
  0x1a   : > { %v375_v8 = vld [vmem:[%s913_s3] sm:$0xff] (!%p259_p7)  ;;  %v758_v10 = vmov (!%p259_p7), 0   ;;  %v376_v11 = vld [vmem:[%s913_s3 + $0x8] sm:$0xff] (!%p259_p7)  ;;  %v322_v13 = vld [vmem:[%s912_s2 + $0x18] sm:$0xff] (!%p259_p7)  ;;  %v759_v19 = vmov (!%p259_p7), 0.0|0.0   ;;  %vm760_vm0 = vmmov (!%p259_p7), 0  }
  0x1b   : > { %262 = sbr.rel (%p259_p7) target bundleno = 552 (0x228), region = 73  ;;  %v319_v9 = vld [vmem:[%s912_s2] sm:$0xff] (!%p259_p7)  ;;  %733 = vset.pattern.permute.xlu1 (!%p259_p7), %v758_v10  ;;  %732 = vset.pattern.permute.xlu0 (!%p259_p7), %v758_v10  ;;  %v320_v12 = vld [vmem:[%s912_s2 + $0x8] sm:$0xff] (!%p259_p7)  ;;  %v321_v14 = vld [vmem:[%s912_s2 + $0x10] sm:$0xff] (!%p259_p7)  ;;  %v761_v26 = vmov (!%p259_p7), 0.0   ;;  %s265_s27 = sand.u32 (!%p259_p7), 1, %s748_s18  }
  0x1c   : > { %385 = vperm.xlu1 (!%p259_p7), %733, %v375_v8   ;;  %329 = vperm.xlu0 (!%p259_p7), %732, %v319_v9   ;;  %v378_v15 = vld [vmem:[%s913_s3 + $0x18] sm:$0xff] (!%p259_p7)  ;;  %v377_v16 = vld [vmem:[%s913_s3 + $0x10] sm:$0xff] (!%p259_p7)  ;;  %v324_v17 = vld [vmem:[%s912_s2 + $0x28] sm:$0xff] (!%p259_p7)  ;;  %s639_s28 = sshll.u32 (!%p259_p7), %s265_s27, 5  ;;  %vm457_vm9 = vcmask (!%p259_p7), 523264   ;;  %p295_p8 = scmp.lt.s32.totalorder (!%p259_p7), %s632_s21, 1 }
  0x1d   : > { %v323_v18 = vld [vmem:[%s912_s2 + $0x20] sm:$0xff] (!%p259_p7)  ;;  %692 = vmatprep.subr.bf16.mxu0 (!%p259_p7), %v759_v19  ;;  %v380_v20 = vld [vmem:[%s913_s3 + $0x28] sm:$0xff] (!%p259_p7)  ;;  %v326_v22 = vld [vmem:[%s912_s2 + $0x38] sm:$0xff] (!%p259_p7)  ;;  %689 = vmatprep.mubr.msk.f32.mxu0 (!%p259_p7), %vm760_vm0, %v761_v26  ;;  %s878_s29 = scalar_lea.vmem (!%p259_p7), [#allocation2], %s639_s28  ;;  %vm538_vm10 = vcmask (!%p259_p7), 7168   ;;  %vm540_vm11 = vcmask (!%p259_p7), 15360  }
  0x1e   : > { %v379_v21 = vld [vmem:[%s913_s3 + $0x20] sm:$0xff] (!%p259_p7)  ;;  %v325_v23 = vld [vmem:[%s912_s2 + $0x30] sm:$0xff] (!%p259_p7)  ;;  %v382_v24 = vld [vmem:[%s913_s3 + $0x38] sm:$0xff] (!%p259_p7) }
  0x1f   : > { %v381_v25 = vld [vmem:[%s913_s3 + $0x30] sm:$0xff] (!%p259_p7)  ;;  %v646_v27 = vld [vmem:[%s878_s29] sm:$0xff] (!%p259_p7)   ;;  %v661_v36 = vld [vmem:[%s878_s29 + $0x8] sm:$0xff] (!%p259_p7)  }
  0x20   : > { %390 = vperm.xlu1 (!%p259_p7), %733, %v376_v11   ;;  %334 = vperm.xlu0 (!%p259_p7), %732, %v320_v12   ;;  %v647_v28 = vunpack.c.l.bf16 (!%p259_p7), %v646_v27  ;;  %v648_v32 = vunpack.c.h.bf16 (!%p259_p7), %v646_v27  ;;  %v652_v39 = vunpack.c.h.bf16 (!%p259_p7), %v661_v36  ;;  %v651_v40 = vunpack.c.l.bf16 (!%p259_p7), %v661_v36  ;;  %v662_v49 = vld [vmem:[%s878_s29 + $0x10] sm:$0xff] (!%p259_p7)   ;;  %v663_v2 = vld [vmem:[%s878_s29 + $0x18] sm:$0xff] (!%p259_p7)  }
  0x21   : > { %v656_v55 = vunpack.c.h.bf16 (!%p259_p7), %v662_v49  ;;  %v655_v56 = vunpack.c.l.bf16 (!%p259_p7), %v662_v49  ;;  %v660_v7 = vunpack.c.h.bf16 (!%p259_p7), %v663_v2  ;;  %v659_v8 = vunpack.c.l.bf16 (!%p259_p7), %v663_v2 }
  0x22   : > { %s920_s21 = smov (!%p295_p8, %s632_s21), 1 }
  0x23   : > { %s640_s6 = sshll.u32 %s920_s21, 2  ;;  %s641_s10 = sshll.u32 %s920_s21, 3 }
  0x24   : > { %344 = vperm.xlu1 %733, %v322_v13   ;;  %339 = vperm.xlu0 %732, %v321_v14   ;;  %s298_s9 = scalar_lea.vmem %s914_s4, %s640_s6  ;;  %s302_s13 = scalar_lea.vmem %s915_s5, %s641_s10 }
  0x28   : > { %400 = vperm.xlu1 %733, %v378_v15   ;;  %395 = vperm.xlu0 %732, %v377_v16  }
  0x2c   : > { %354 = vperm.xlu1 %733, %v324_v17   ;;  %349 = vperm.xlu0 %732, %v323_v18  }
  0x30   : > { %410 = vperm.xlu1 %733, %v380_v20   ;;  %405 = vperm.xlu0 %732, %v379_v21  }
  0x34   : > { %364 = vperm.xlu1 %733, %v326_v22   ;;  %359 = vperm.xlu0 %732, %v325_v23  }
  0x38   : > { %420 = vperm.xlu1 %733, %v382_v24   ;;  %415 = vperm.xlu0 %732, %v381_v25   ;;  %v455_v25 = vld [vmem:[%s911_s1] sm:$0xf] }
  0x9b   : > { %v386_v29 = vpop.permute.xlu1 %385  ;;  %v330_v30 = vpop.permute.xlu0 %329 }
  0x9c   : > { %v367_v31 = vmul.f32 %v647_v28, %v330_v30 }
  0x9e   : > { %v423_v33 = vadd.f32 %v386_v29, %v367_v31  ;;  %v456_v29 = vunpack.c.l.bf16 %v455_v25 }
  0x9f   : > { %v391_v34 = vpop.permute.xlu1 %390  ;;  %v335_v35 = vpop.permute.xlu0 %334 }
  0xa0   : > { %v368_v37 = vmul.f32 %v648_v32, %v335_v35  ;;  %v439_v41 = vmul.f32 0.2, %v423_v33  ;;  %vm431_vm1 = vcmp.ge.f32.partialorder %v423_v33, 0.0 }
  0xa2   : > { %v424_v38 = vadd.f32 %v391_v34, %v368_v37  ;;  %v447_v47 = vsel %vm431_vm1, %v423_v33, %v439_v41 }
  0xa3   : > { %v345_v42 = vpop.permute.xlu1 %344  ;;  %v340_v43 = vpop.permute.xlu0 %339 }
  0xa4   : > { %vm432_vm2 = vcmp.ge.f32.partialorder %v424_v38, 0.0  ;;  %v440_v44 = vmul.f32 0.2, %v424_v38  ;;  %v370_v45 = vmul.f32 %v652_v39, %v345_v42  ;;  %v369_v46 = vmul.f32 %v651_v40, %v340_v43 }
  0xa6   : > { %v448_v48 = vsel %vm432_vm2, %v424_v38, %v440_v44 }
  0xa7   : > { %v401_v50 = vpop.permute.xlu1 %400  ;;  %v396_v51 = vpop.permute.xlu0 %395  ;;  %v693_v52 = vpack.c.bf16 %v448_v48, %v447_v47 }
  0xa8   : > { %v426_v53 = vadd.f32 %v401_v50, %v370_v45  ;;  %v425_v54 = vadd.f32 %v396_v51, %v369_v46 }
  0xa9   : > { %694 = vmatpush3.bf16.msra.mxu0 %v693_v52 }
  0xaa   : > { %vm434_vm3 = vcmp.ge.f32.partialorder %v426_v53, 0.0  ;;  %v442_v57 = vmul.f32 0.2, %v426_v53  ;;  %vm433_vm4 = vcmp.ge.f32.partialorder %v425_v54, 0.0  ;;  %v441_v58 = vmul.f32 0.2, %v425_v54  ;;  %695 = vmatprep.subr.bf16.mxu0 %v759_v19 }
  0xab   : > { %v355_v59 = vpop.permute.xlu1 %354  ;;  %v350_v60 = vpop.permute.xlu0 %349 }
  0xac   : > { %v449_v61 = vsel %vm433_vm4, %v425_v54, %v441_v58  ;;  %v450_v62 = vsel %vm434_vm3, %v426_v53, %v442_v57  ;;  %v372_v0 = vmul.f32 %v656_v55, %v355_v59  ;;  %v371_v1 = vmul.f32 %v655_v56, %v350_v60 }
  0xad   : > { %v696_v63 = vpack.c.bf16 %v450_v62, %v449_v61 }
  0xaf   : > { %v411_v3 = vpop.permute.xlu1 %410  ;;  %v406_v4 = vpop.permute.xlu0 %405  ;;  %697 = vmatpush3.bf16.msra.mxu0 %v696_v63 }
  0xb0   : > { %v428_v5 = vadd.f32 %v411_v3, %v372_v0  ;;  %v427_v6 = vadd.f32 %v406_v4, %v371_v1  ;;  %698 = vmatprep.subr.bf16.mxu0 %v759_v19 }
  0xb2   : > { %vm436_vm5 = vcmp.ge.f32.partialorder %v428_v5, 0.0  ;;  %v444_v9 = vmul.f32 0.2, %v428_v5  ;;  %vm435_vm6 = vcmp.ge.f32.partialorder %v427_v6, 0.0  ;;  %v443_v10 = vmul.f32 0.2, %v427_v6 }
  0xb3   : > { %v365_v11 = vpop.permute.xlu1 %364  ;;  %v360_v12 = vpop.permute.xlu0 %359 }
  0xb4   : > { %v451_v13 = vsel %vm435_vm6, %v427_v6, %v443_v10  ;;  %v452_v14 = vsel %vm436_vm5, %v428_v5, %v444_v9  ;;  %v374_v16 = vmul.f32 %v660_v7, %v365_v11  ;;  %v373_v17 = vmul.f32 %v659_v8, %v360_v12 }
  0xb5   : > { %v699_v15 = vpack.c.bf16 %v452_v14, %v451_v13 }
  0xb7   : > { %v421_v18 = vpop.permute.xlu1 %420  ;;  %v416_v20 = vpop.permute.xlu0 %415  ;;  %700 = vmatpush3.bf16.msra.mxu0 %v699_v15 }
  0xb8   : > { %v430_v21 = vadd.f32 %v421_v18, %v374_v16  ;;  %v429_v22 = vadd.f32 %v416_v20, %v373_v17  ;;  %701 = vmatprep.subr.bf16.mxu0 %v759_v19 }
  0xba   : > { %vm438_vm7 = vcmp.ge.f32.partialorder %v430_v21, 0.0  ;;  %v446_v23 = vmul.f32 0.2, %v430_v21  ;;  %vm437_vm8 = vcmp.ge.f32.partialorder %v429_v22, 0.0  ;;  %v445_v24 = vmul.f32 0.2, %v429_v22 }
  0xbc   : > { %v453_v26 = vsel %vm437_vm8, %v429_v22, %v445_v24  ;;  %v454_v27 = vsel %vm438_vm7, %v430_v21, %v446_v23 }
  0xbd   : > { %v702_v28 = vpack.c.bf16 %v454_v27, %v453_v26 }
  0xbf   : > { %703 = vmatpush3.bf16.msra.mxu0 %v702_v28 }
  0xc2   : > { %690 = vmatmul.mubr.msk.f32.vlgmr.msra.gmra.mrb[0].mxu0 %vm457_vm9, %v456_v29 }
 0x195   : > { %v527_v19 = vpop.f32.mrb[0].mxu0 }
 0x196   : > { %v531_v30 = vpack.c.bf16 %v527_v19, %v527_v19  ;;  %533 = vadd.xlane.f32.xlu0 %v527_v19  ;;  %v691_v31 = vpop.f32.mrb[1].mxu0  ;;  %v535_v32 = vmul.f32 %v527_v19, %v527_v19 }
 0x198   : > { %532 = vst [vmem:[%s298_s9] sm:$0xf] %v531_v30  ;;  %536 = vadd.xlane.f32.xlu1 %v535_v32 }
 0x223   : > { %v534_v33 = vpop.xlane.xlu0 %533 }
 0x225   : > { %v537_v34 = vpop.xlane.xlu1 %536 }
 0x226   : > { %v539_v35 = vsel %vm538_vm10, %v534_v33, %v537_v34 }
 0x227   : > { %541 = vst.msk [vmem:[%s302_s13] sm:$0xff] %vm540_vm11, %v539_v35 }
 0x228 PF: > { %p13_p9 = scmp.ge.s32.totalorder %s809_s22, 4   ;;  %s916_s18 = smov %s752_s19 }
 0x229   : > { %s917_s19 = smov %s818_s25  ;;  %s918_s20 = smov %s809_s22 }
 0x22a   :  { %15 = sbr.rel (!%p13_p9) target bundleno = 2 (0x2), region = 124 }

// kernel: tile.13
= control target key start
LH: loop header
LB: loop body
LE: loop exit
PB: predicated region body
PF: predicated region fallthrough
CT: control target
= control target key end

     0   :  { %s22_s0 = inlined_call_operand.vmem [shape: f32[4], index: 0, kind: input, shape index: {}]   ;;  %s23_s1 = inlined_call_operand.vmem [shape: f32[4,4], index: 1, kind: output, shape index: {}]  }
   0x1   :  { %v4_v0 = vld [vmem:[%s22_s0] ss:$0 sm:$0xff] }
   0x2   :  { %5 = vst [vmem:[%s23_s1] sm:$0xf] %v4_v0 }

// kernel: tile.0
= control target key start
LH: loop header
LB: loop body
LE: loop exit
PB: predicated region body
PF: predicated region fallthrough
CT: control target
= control target key end

     0   :  { %s34_s8 = smov 125   ;;  %vm7_vm0 = vcmask 7168   ;;  %s35_s11 = smov 126   ;;  %s61_s0 = inlined_call_operand.vmem [shape: f32[4,4], index: 0, kind: input, shape index: {}]   ;;  %s62_s1 = inlined_call_operand.vmem [shape: f32[16,1], index: 1, kind: output, shape index: {}]  }
   0x1   :  { %v4_v0 = vld [vmem:[%s61_s0] sm:$0xf]  ;;  %s33_s0 = smov 127  }
   0x2   :  { %5 = vst [vmem:[#allocation0] sm:$0xf] %v4_v0 }
   0x9   :  { %v9_v1 = vld [vmem:[#allocation0] sm:$0xf]  }
   0xa   :  { %v21_v2 = vld [vmem:[#allocation0] sm:$0xf]   ;;  %10 = vrot.lane.b32.xlu0 %v9_v1, %s33_s0 }
   0xb   :  { %22 = vrot.lane.b32.xlu1 %v21_v2, %s34_s8  ;;  %v6_v3 = vld [vmem:[#allocation0] sm:$0xf]  }
   0xc   :  { %v15_v4 = vld [vmem:[#allocation0] sm:$0xf]   ;;  %8 = vst.msk [vmem:[%s62_s1] ss:$4 sm:$0xf] %vm7_vm0, %v6_v3  }
   0xe   :  { %16 = vrot.lane.b32.xlu0 %v15_v4, %s35_s11 }
  0x7c   :  { %v11_v5 = vpop.permute.xlu0 %10  }
  0x7d   :  { %v23_v6 = vpop.permute.xlu1 %22   ;;  %27 = vst.msk [vmem:[%s62_s1 + $0x1] ss:$4 sm:$0xf] %vm7_vm0, %v11_v5  }
  0x7e   :  { %29 = vst.msk [vmem:[%s62_s1 + $0x3] ss:$4 sm:$0xf] %vm7_vm0, %v23_v6  }
  0x80   :  { %v17_v7 = vpop.permute.xlu0 %16  }
  0x81   :  { %28 = vst.msk [vmem:[%s62_s1 + $0x2] ss:$4 sm:$0xf] %vm7_vm0, %v17_v7  }

// kernel: encoder_decoder_forward.4
= control target key start
LH: loop header
LB: loop body
LE: loop exit
PB: predicated region body
PF: predicated region fallthrough
CT: control target
= control target key end

     0   :  { %s891_s18 = smov 0   ;;  %s893_s19 = smov 0   ;;  %s1030_s0 = inlined_call_operand.vmem [shape: bf16[72,256], index: 0, kind: input, shape index: {}]   ;;  %s1031_s1 = inlined_call_operand.vmem [shape: bf16[16,72], index: 1, kind: input, shape index: {}]   ;;  %s1032_s2 = inlined_call_operand.vmem [shape: f32[72,1], index: 2, kind: input, shape index: {}]   ;;  %s1033_s3 = inlined_call_operand.vmem [shape: f32[72,1], index: 3, kind: input, shape index: {}]   ;;  %s1034_s4 = inlined_call_operand.vmem [shape: bf16[16,256], index: 4, kind: output, shape index: {0}]   ;;  %s1035_s5 = inlined_call_operand.vmem [shape: f32[2,16,2], index: 5, kind: output, shape index: {1}]  }
   0x1   :  { %s895_s20 = smov 0  }
   0x2 LB: > { %s907_s21 = sadd.s32 4294967295, %s858_s20   ;;  %s910_s22 = sadd.s32 1, %s858_s20   ;;  %s858_s20 = sphi %s895_s20, %s1039_s20   ;;  %s854_s19 = sphi %s893_s19, %s1038_s19   ;;  %s850_s18 = sphi %s891_s18, %s1037_s18  }
   0x3   : > { %s20_s23 = ssub.s32 %s858_s20, %s910_s22  ;;  %s23_s24 = sadd.s32 1, %s854_s19 }
   0x4   : > { %p21_p0 = scmp.eq.s32.totalorder %s20_s23, 0  ;;  %p30_p1 = scmp.ne.s32.totalorder %s854_s19, %s850_s18 }
   0x5   : > { %p31_p2 = scmp.eq.s32.totalorder %s858_s20, 0  ;;  %p123_p3 = scmp.eq.s32.totalorder %s907_s21, 1 }
   0x6   : > { %s920_s25 = scalar_select %p21_p0, %s854_s19, %s23_s24  }
   0x7   : > { %p32_p4 = por %p31_p2, %p30_p1  ;;  %p922_p5 = por %p123_p3, %p30_p1 }
   0x8   : > { %p714_p6 = scmp.ge.s32.totalorder %s858_s20, 2 }
   0xa   : > { %180 = sbr.rel (%p714_p6) target bundleno = 27 (0x1b), region = 28 }
  0x11   : > { %183 = sbr.rel (!%p32_p4) target bundleno = 27 (0x1b), region = 32  ;;  %s185_s27 = sand.u32 (%p32_p4), 1, %s854_s19  }
  0x12   : > { %s715_s28 = sshll.u32 (%p32_p4), %s858_s20, 2  ;;  %s807_s29 = smul.u32 (%p32_p4), 36, %s185_s27 }
  0x13   : > { %s189_s7 = scalar_lea.vmem (%p32_p4), %s1030_s0, %s715_s28 }
  0x14   : > { %v205_v0 = vld [vmem:[%s189_s7] sm:$0xf] (%p32_p4)  ;;  %v207_v1 = vld [vmem:[%s189_s7 + $0x8] sm:$0xf] (%p32_p4)  ;;  %v209_v2 = vld [vmem:[%s189_s7 + $0x10] sm:$0xf] (%p32_p4) }
  0x15   : > { %v211_v3 = vld [vmem:[%s189_s7 + $0x18] sm:$0xf] (%p32_p4)  ;;  %v213_v4 = vld [vmem:[%s189_s7 + $0x20] sm:$0xf] (%p32_p4)  ;;  %s187_s8 = scalar_lea.vmem (%p32_p4), [#allocation2], %s807_s29 }
  0x16   : > { %206 = vst [vmem:[%s187_s8] sm:$0xf] (%p32_p4), %v205_v0  ;;  %208 = vst [vmem:[%s187_s8 + $0x4] sm:$0xf] (%p32_p4), %v207_v1  ;;  %v215_v5 = vld [vmem:[%s189_s7 + $0x28] sm:$0xf] (%p32_p4) }
  0x17   : > { %210 = vst [vmem:[%s187_s8 + $0x8] sm:$0xf] (%p32_p4), %v209_v2  ;;  %212 = vst [vmem:[%s187_s8 + $0xc] sm:$0xf] (%p32_p4), %v211_v3  ;;  %v217_v6 = vld [vmem:[%s189_s7 + $0x30] sm:$0xf] (%p32_p4) }
  0x18   : > { %214 = vst [vmem:[%s187_s8 + $0x10] sm:$0xf] %v213_v4  ;;  %v219_v7 = vld [vmem:[%s189_s7 + $0x38] sm:$0xf]  ;;  %216 = vst [vmem:[%s187_s8 + $0x14] sm:$0xf] %v215_v5 }
  0x19   : > { %218 = vst [vmem:[%s187_s8 + $0x18] sm:$0xf] %v217_v6  ;;  %220 = vst [vmem:[%s187_s8 + $0x1c] sm:$0xf] %v219_v7  ;;  %v221_v8 = vld [vmem:[%s189_s7 + $0x40] sm:$0xf] }
  0x1a   : > { %222 = vst [vmem:[%s187_s8 + $0x20] sm:$0xf] %v221_v8 }
  0x1b PF: > { %p716_p7 = scmp.ge.s32.totalorder %s858_s20, 1  ;;  %p262_p8 = scmp.lt.s32.totalorder %s858_s20, 3 }
  0x1d   : > { %p263_p9 = pnand %p716_p7, %p262_p8 }
  0x1e   : > { %v386_v9 = vld [vmem:[%s1033_s3] sm:$0xff] (!%p263_p9)  ;;  %v860_v11 = vmov (!%p263_p9), 0   ;;  %v387_v12 = vld [vmem:[%s1033_s3 + $0x8] sm:$0xff] (!%p263_p9)  ;;  %v326_v14 = vld [vmem:[%s1032_s2 + $0x18] sm:$0xff] (!%p263_p9)  ;;  %vm462_vm0 = vcmask (!%p263_p9), 588800   ;;  %s269_s9 = sand.u32 (!%p263_p9), 1, %s850_s18  }
  0x1f   : > { %266 = sbr.rel (%p263_p9) target bundleno = 565 (0x235), region = 73  ;;  %v323_v10 = vld [vmem:[%s1032_s2] sm:$0xff] (!%p263_p9)  ;;  %835 = vset.pattern.permute.xlu1 (!%p263_p9), %v860_v11  ;;  %834 = vset.pattern.permute.xlu0 (!%p263_p9), %v860_v11  ;;  %v324_v13 = vld [vmem:[%s1032_s2 + $0x8] sm:$0xff] (!%p263_p9)  ;;  %v325_v15 = vld [vmem:[%s1032_s2 + $0x10] sm:$0xff] (!%p263_p9)  ;;  %s717_s12 = sshll.u32 (!%p263_p9), %s269_s9, 3  ;;  %vm564_vm1 = vcmask (!%p263_p9), 7168  }
  0x20   : > { %397 = vperm.xlu1 (!%p263_p9), %835, %v386_v9   ;;  %334 = vperm.xlu0 (!%p263_p9), %834, %v323_v10   ;;  %v389_v16 = vld [vmem:[%s1033_s3 + $0x18] sm:$0xff] (!%p263_p9)  ;;  %v388_v17 = vld [vmem:[%s1033_s3 + $0x10] sm:$0xff] (!%p263_p9)  ;;  %v328_v18 = vld [vmem:[%s1032_s2 + $0x28] sm:$0xff] (!%p263_p9)  ;;  %s808_s10 = smul.u32 (!%p263_p9), 36, %s269_s9  ;;  %s292_s13 = scalar_lea.vmem (!%p263_p9), [#allocation3], %s717_s12  ;;  %vm567_vm2 = vcmask (!%p263_p9), 15360  }
  0x21   : > { %v327_v19 = vld [vmem:[%s1032_s2 + $0x20] sm:$0xff] (!%p263_p9)  ;;  %v391_v20 = vld [vmem:[%s1033_s3 + $0x28] sm:$0xff] (!%p263_p9)  ;;  %v330_v22 = vld [vmem:[%s1032_s2 + $0x38] sm:$0xff] (!%p263_p9)  ;;  %p300_p10 = scmp.lt.s32.totalorder (!%p263_p9), %s907_s21, 1 }
  0x22   : > { %v390_v21 = vld [vmem:[%s1033_s3 + $0x20] sm:$0xff] (!%p263_p9)  ;;  %v329_v23 = vld [vmem:[%s1032_s2 + $0x30] sm:$0xff] (!%p263_p9)  ;;  %v393_v24 = vld [vmem:[%s1033_s3 + $0x38] sm:$0xff] (!%p263_p9)  ;;  %s998_s11 = scalar_lea.vmem (!%p263_p9), [#allocation2], %s808_s10 }
  0x23   : > { %v392_v25 = vld [vmem:[%s1033_s3 + $0x30] sm:$0xff] (!%p263_p9)  ;;  %v394_v26 = vld [vmem:[%s1033_s3 + $0x40] sm:$0xff] (!%p263_p9) }
  0x24   : > { %402 = vperm.xlu1 (!%p263_p9), %835, %v387_v12   ;;  %339 = vperm.xlu0 (!%p263_p9), %834, %v324_v13   ;;  %v331_v27 = vld [vmem:[%s1032_s2 + $0x40] sm:$0xff] (!%p263_p9)  ;;  %v756_v38 = vld [vmem:[%s998_s11 + $0x8] sm:$0xff] (!%p263_p9)   ;;  %v757_v53 = vld [vmem:[%s998_s11 + $0x10] sm:$0xff] (!%p263_p9)  }
  0x25   : > { %v991_v28 = vld [vmem:[%s1031_s1] sm:$0xff] (!%p263_p9)   ;;  %v738_v42 = vunpack.c.h.bf16 (!%p263_p9), %v756_v38  ;;  %v737_v43 = vunpack.c.l.bf16 (!%p263_p9), %v756_v38  ;;  %v742_v58 = vunpack.c.h.bf16 (!%p263_p9), %v757_v53  ;;  %v741_v59 = vunpack.c.l.bf16 (!%p263_p9), %v757_v53 }
  0x26   : > { %v749_v29 = vunpack.c.l.bf16 %v991_v28  ;;  %v732_v30 = vld [vmem:[%s998_s11] sm:$0xff]   ;;  %v758_v3 = vld [vmem:[%s998_s11 + $0x18] sm:$0xff]   ;;  %s301_s14 = scalar_select %p300_p10, %s907_s21, 1 }
  0x27   : > { %v733_v31 = vunpack.c.l.bf16 %v732_v30  ;;  %v734_v35 = vunpack.c.h.bf16 %v732_v30  ;;  %v746_v8 = vunpack.c.h.bf16 %v758_v3  ;;  %v745_v9 = vunpack.c.l.bf16 %v758_v3  ;;  %v313_v13 = vld [vmem:[%s998_s11 + $0x20] sm:$0xf]  ;;  %s725_s20 = sshll.u32 (%p922_p5), %s907_s21, 2 }
  0x28   : > { %349 = vperm.xlu1 %835, %v326_v14   ;;  %344 = vperm.xlu0 %834, %v325_v15   ;;  %v750_v30 = vunpack.c.h.bf16 %v991_v28  ;;  %s728_s15 = sshll.u32 %s301_s14, 4  ;;  %s583_s27 = scalar_lea.vmem (%p922_p5), %s1034_s4, %s725_s20 }
  0x29   : > { %788 = vmatprep.mubr.msk.f32.mxu0 %vm462_vm0, %v749_v29  ;;  %s304_s18 = scalar_lea.vmem %s1035_s5, %s728_s15 }
  0x2c   : > { %412 = vperm.xlu1 %835, %v389_v16   ;;  %407 = vperm.xlu0 %834, %v388_v17  }
  0x30   : > { %359 = vperm.xlu1 %835, %v328_v18   ;;  %354 = vperm.xlu0 %834, %v327_v19  }
  0x34   : > { %422 = vperm.xlu1 %835, %v391_v20   ;;  %417 = vperm.xlu0 %834, %v390_v21   ;;  %v322_v20 = vunpack.c.l.bf16 %v313_v13 }
  0x38   : > { %369 = vperm.xlu1 %835, %v330_v22   ;;  %364 = vperm.xlu0 %834, %v329_v23  }
  0x3c   : > { %432 = vperm.xlu1 %835, %v393_v24   ;;  %427 = vperm.xlu0 %834, %v392_v25  }
  0x40   : > { %437 = vperm.xlu1 %835, %v394_v26   ;;  %374 = vperm.xlu0 %834, %v331_v27  }
  0x9f   : > { %v398_v32 = vpop.permute.xlu1 %397  ;;  %v335_v33 = vpop.permute.xlu0 %334 }
  0xa0   : > { %v377_v34 = vmul.f32 %v733_v31, %v335_v33 }
  0xa2   : > { %v440_v39 = vadd.f32 %v398_v32, %v377_v34 }
  0xa3   : > { %v403_v36 = vpop.permute.xlu1 %402  ;;  %v340_v37 = vpop.permute.xlu0 %339 }
  0xa4   : > { %v378_v40 = vmul.f32 %v734_v35, %v340_v37  ;;  %v449_v46 = vmax.f32 %v440_v39, 0.0 }
  0xa6   : > { %v441_v41 = vadd.f32 %v403_v36, %v378_v40 }
  0xa7   : > { %v350_v44 = vpop.permute.xlu1 %349  ;;  %v345_v45 = vpop.permute.xlu0 %344 }
  0xa8   : > { %v450_v47 = vmax.f32 %v441_v41, 0.0  ;;  %v380_v48 = vmul.f32 %v738_v42, %v350_v44  ;;  %v379_v49 = vmul.f32 %v737_v43, %v345_v45 }
  0xaa   : > { %v791_v50 = vpack.c.bf16 %v450_v47, %v449_v46 }
  0xab   : > { %v413_v51 = vpop.permute.xlu1 %412  ;;  %v408_v52 = vpop.permute.xlu0 %407 }
  0xac   : > { %v443_v54 = vadd.f32 %v413_v51, %v380_v48  ;;  %v442_v55 = vadd.f32 %v408_v52, %v379_v49  ;;  %792 = vmatprep.subr.bf16.mxu0 %v791_v50 }
  0xad   : > { %794 = vmatpush3.bf16.msra.mxu0 %v791_v50 }
  0xae   : > { %v452_v56 = vmax.f32 %v443_v54, 0.0  ;;  %v451_v57 = vmax.f32 %v442_v55, 0.0 }
  0xaf   : > { %v360_v60 = vpop.permute.xlu1 %359  ;;  %v355_v61 = vpop.permute.xlu0 %354 }
  0xb0   : > { %v795_v62 = vpack.c.bf16 %v452_v56, %v451_v57  ;;  %v382_v63 = vmul.f32 %v742_v58, %v360_v60  ;;  %v381_v0 = vmul.f32 %v741_v59, %v355_v61 }
  0xb2   : > { %796 = vmatprep.subr.bf16.mxu0 %v795_v62 }
  0xb3   : > { %v423_v1 = vpop.permute.xlu1 %422  ;;  %v418_v2 = vpop.permute.xlu0 %417  ;;  %798 = vmatpush3.bf16.msra.mxu0 %v795_v62 }
  0xb4   : > { %v445_v4 = vadd.f32 %v423_v1, %v382_v63  ;;  %v444_v5 = vadd.f32 %v418_v2, %v381_v0 }
  0xb6   : > { %v454_v6 = vmax.f32 %v445_v4, 0.0  ;;  %v453_v7 = vmax.f32 %v444_v5, 0.0 }
  0xb7   : > { %v370_v10 = vpop.permute.xlu1 %369  ;;  %v365_v11 = vpop.permute.xlu0 %364 }
  0xb8   : > { %v799_v12 = vpack.c.bf16 %v454_v6, %v453_v7  ;;  %v384_v14 = vmul.f32 %v746_v8, %v370_v10  ;;  %v383_v15 = vmul.f32 %v745_v9, %v365_v11 }
  0xba   : > { %800 = vmatprep.subr.bf16.mxu0 %v799_v12 }
  0xbb   : > { %v433_v16 = vpop.permute.xlu1 %432  ;;  %v428_v17 = vpop.permute.xlu0 %427  ;;  %802 = vmatpush3.bf16.msra.mxu0 %v799_v12 }
  0xbc   : > { %v447_v18 = vadd.f32 %v433_v16, %v384_v14  ;;  %v446_v19 = vadd.f32 %v428_v17, %v383_v15 }
  0xbe   : > { %v456_v21 = vmax.f32 %v447_v18, 0.0  ;;  %v455_v22 = vmax.f32 %v446_v19, 0.0 }
  0xbf   : > { %v375_v23 = vpop.permute.xlu0 %374  ;;  %v438_v26 = vpop.permute.xlu1 %437 }
  0xc0   : > { %v803_v24 = vpack.c.bf16 %v456_v21, %v455_v22  ;;  %v385_v25 = vmul.f32 %v375_v23, %v322_v20 }
  0xc2   : > { %v448_v27 = vadd.f32 %v438_v26, %v385_v25  ;;  %804 = vmatprep.subr.bf16.mxu0 %v803_v24 }
  0xc3   : > { %806 = vmatpush3.bf16.msra.mxu0 %v803_v24 }
  0xc4   : > { %v457_v29 = vmax.f32 %v448_v27, 0.0 }
  0xc6   : > { %786 = vmatprep.subr.mxu0 %v457_v29 }
  0xc7   : > { %787 = vmatpush3.msra.mxu0 %v457_v29 }
  0xc8   : > { %789 = vmatmul.mubr.msk.f32.vlgmr.msra.gmra.mrb[0].mxu0 %vm462_vm0, %v750_v30 }
 0x19b   : > { %v790_v31 = vpop.f32.mrb[0].mxu0 }
 0x19c   : > { %556 = vadd.xlane.f32.xlu1 %v790_v31  ;;  %v535_v32 = vpop.f32.mrb[1].mxu0  ;;  %v559_v35 = vmul.f32 %v790_v31, %v790_v31 }
 0x19d   : > { %v754_v33 = vpack.c.bf16 %v790_v31, %v535_v32  ;;  %554 = vadd.xlane.f32.xlu0 %v535_v32  ;;  %v558_v34 = vmul.f32 %v535_v32, %v535_v32 }
 0x19f   : > { %755 = vst [vmem:[%s292_s13] sm:$0xff] %v754_v33  }
 0x1a1   : > { %560 = vadd.xlane.f32.xlu0 %v558_v34 }
 0x1a5   : > { %562 = vadd.xlane.f32.xlu0 %v559_v35 }
 0x1a6   : > { %v599_v41 = vld [vmem:[%s292_s13] sm:$0xf] (%p922_p5)  ;;  %v601_v42 = vld [vmem:[%s292_s13 + $0x4] sm:$0xf] (%p922_p5) }
 0x1a7   : > { %600 = vst [vmem:[%s583_s27] sm:$0xf] (%p922_p5), %v599_v41  ;;  %602 = vst [vmem:[%s583_s27 + $0x8] sm:$0xf] (%p922_p5), %v601_v42 }
 0x229   : > { %v557_v38 = vpop.xlane.xlu1 %556 }
 0x22a   : > { %v555_v28 = vpop.xlane.xlu0 %554 }
 0x22e   : > { %v561_v36 = vpop.xlane.xlu0 %560  ;;  %581 = sbr.rel (!%p922_p5) target bundleno = 565 (0x235), region = 81 }
 0x22f   : > { %v565_v37 = vsel %vm564_vm1, %v555_v28, %v561_v36 }
 0x230   : > { %568 = vst.msk [vmem:[%s304_s18] sm:$0xff] %vm567_vm2, %v565_v37 }
 0x232   : > { %v563_v39 = vpop.xlane.xlu0 %562 }
 0x233   : > { %v566_v40 = vsel %vm564_vm1, %v557_v38, %v563_v39 }
 0x234   : > { %569 = vst.msk [vmem:[%s304_s18 + $0x8] sm:$0xff] %vm567_vm2, %v566_v40 }
 0x235 PF: > { %p13_p11 = scmp.ge.s32.totalorder %s910_s22, 4   ;;  %s1037_s18 = smov %s854_s19 }
 0x236   : > { %s1038_s19 = smov %s920_s25  ;;  %s1039_s20 = smov %s910_s22 }
 0x237   :  { %15 = sbr.rel (!%p13_p11) target bundleno = 2 (0x2), region = 165 }

// kernel: encoder_decoder_forward.5
= control target key start
LH: loop header
LB: loop body
LE: loop exit
PB: predicated region body
PF: predicated region fallthrough
CT: control target
= control target key end

     0   :  { %s458_s12 = smov 0   ;;  %s460_s13 = smov 0   ;;  %s530_s0 = inlined_call_operand.vmem [shape: bf16[16,256], index: 0, kind: input, shape index: {}]   ;;  %s531_s1 = inlined_call_operand.vmem [shape: f32[16,1], index: 1, kind: input, shape index: {}]   ;;  %s532_s2 = inlined_call_operand.vmem [shape: f32[16,1], index: 2, kind: input, shape index: {}]   ;;  %s533_s3 = inlined_call_operand.vmem [shape: bf16[16,256], index: 3, kind: output, shape index: {}]  }
   0x1   :  { %s462_s14 = smov 0  }
   0x2 LB: > { %s360_s15 = sadd.s32 4294967295, %s435_s14   ;;  %s475_s16 = sadd.s32 1, %s435_s14   ;;  %s435_s14 = sphi %s462_s14, %s537_s14   ;;  %s431_s13 = sphi %s460_s13, %s536_s13   ;;  %s427_s12 = sphi %s458_s12, %s535_s12  }
   0x3   : > { %s17_s17 = ssub.s32 %s435_s14, %s475_s16  ;;  %s20_s18 = sadd.s32 1, %s431_s13 }
   0x4   : > { %p18_p0 = scmp.eq.s32.totalorder %s17_s17, 0  ;;  %p27_p1 = scmp.ne.s32.totalorder %s431_s13, %s427_s12 }
   0x5   : > { %p28_p2 = scmp.eq.s32.totalorder %s435_s14, 0  ;;  %p99_p3 = scmp.eq.s32.totalorder %s360_s15, 1 }
   0x6   : > { %s486_s19 = scalar_select %p18_p0, %s431_s13, %s20_s18  }
   0x7   : > { %p29_p4 = por %p28_p2, %p27_p1  ;;  %p488_p5 = por %p99_p3, %p27_p1 }
   0x8   : > { %p363_p6 = scmp.ge.s32.totalorder %s435_s14, 2 }
   0xa   : > { %127 = sbr.rel (%p363_p6) target bundleno = 24 (0x18), region = 24 }
  0x11   : > { %130 = sbr.rel (!%p29_p4) target bundleno = 24 (0x18), region = 28  ;;  %s132_s21 = sand.u32 (%p29_p4), 1, %s431_s13  }
  0x12   : > { %s365_s22 = sshll.u32 (%p29_p4), %s435_s14, 2  ;;  %s364_s23 = sshll.u32 (%p29_p4), %s132_s21, 3 }
  0x13   : > { %s136_s26 = scalar_lea.vmem (%p29_p4), %s530_s0, %s365_s22  ;;  %s134_s27 = scalar_lea.vmem (%p29_p4), [#allocation2], %s364_s23 }
  0x14   : > { %v152_v0 = vld [vmem:[%s136_s26] sm:$0xf] (%p29_p4)  ;;  %v154_v1 = vld [vmem:[%s136_s26 + $0x8] sm:$0xf] (%p29_p4) }
  0x15   : > { %153 = vst [vmem:[%s134_s27] sm:$0xf] (%p29_p4), %v152_v0  ;;  %155 = vst [vmem:[%s134_s27 + $0x4] sm:$0xf] (%p29_p4), %v154_v1 }
  0x18 PF: > { %p366_p7 = scmp.ge.s32.totalorder %s435_s14, 1  ;;  %p181_p8 = scmp.lt.s32.totalorder %s435_s14, 3 }
  0x1a   : > { %p182_p9 = pnand %p366_p7, %p181_p8 }
  0x1b   : > { %v228_v2 = vld [vmem:[%s532_s2] sm:$0xff] (!%p182_p9)  ;;  %v437_v4 = vmov (!%p182_p9), 0   ;;  %v229_v5 = vld [vmem:[%s532_s2 + $0x8] sm:$0xff] (!%p182_p9)  ;;  %s188_s9 = sand.u32 (!%p182_p9), 1, %s427_s12  }
  0x1c   : > { %185 = sbr.rel (%p182_p9) target bundleno = 176 (0xb0), region = 69  ;;  %v214_v3 = vld [vmem:[%s531_s1] sm:$0xff] (!%p182_p9)  ;;  %412 = vset.pattern.permute.xlu1 (!%p182_p9), %v437_v4  ;;  %411 = vset.pattern.permute.xlu0 (!%p182_p9), %v437_v4  ;;  %v215_v6 = vld [vmem:[%s531_s1 + $0x8] sm:$0xff] (!%p182_p9)  ;;  %s367_s10 = sshll.u32 (!%p182_p9), %s188_s9, 3 }
  0x1d   : > { %232 = vperm.xlu1 (!%p182_p9), %412, %v228_v2   ;;  %218 = vperm.xlu0 (!%p182_p9), %411, %v214_v3   ;;  %s190_s11 = scalar_lea.vmem (!%p182_p9), [#allocation2], %s367_s10  ;;  %s209_s17 = scalar_lea.vmem (!%p182_p9), [#allocation3], %s367_s10 }
  0x1e   : > { %v378_v7 = vld [vmem:[%s190_s11] sm:$0xff] (!%p182_p9)  }
  0x1f   : > { %v379_v8 = vunpack.c.l.bf16 (!%p182_p9), %v378_v7  ;;  %v380_v11 = vunpack.c.h.bf16 (!%p182_p9), %v378_v7 }
  0x21   : > { %237 = vperm.xlu1 (!%p182_p9), %412, %v229_v5   ;;  %223 = vperm.xlu0 (!%p182_p9), %411, %v215_v6  }
  0x23   : > { %s372_s12 = sshll.u32 (%p488_p5), %s360_s15, 2 }
  0x24   : > { %s260_s22 = scalar_lea.vmem (%p488_p5), %s533_s3, %s372_s12 }
  0x9c   : > { %v233_v9 = vpop.permute.xlu1 %232  ;;  %v219_v10 = vpop.permute.xlu0 %218 }
  0x9d   : > { %v226_v12 = vmul.f32 %v379_v8, %v219_v10 }
  0x9f   : > { %v240_v16 = vadd.f32 %v233_v9, %v226_v12 }
  0xa0   : > { %v224_v13 = vpop.permute.xlu0 %223  ;;  %v238_v15 = vpop.permute.xlu1 %237 }
  0xa1   : > { %v227_v14 = vmul.f32 %v380_v11, %v224_v13  ;;  %258 = sbr.rel (!%p488_p5) target bundleno = 176 (0xb0), region = 77 }
  0xa3   : > { %v241_v17 = vadd.f32 %v238_v15, %v227_v14 }
  0xa5   : > { %v384_v18 = vpack.c.bf16 %v241_v17, %v240_v16 }
  0xa7   : > { %385 = vst [vmem:[%s209_s17] sm:$0xff] %v384_v18  }
  0xae   : > { %v276_v19 = vld [vmem:[%s209_s17] sm:$0xf]  ;;  %v278_v20 = vld [vmem:[%s209_s17 + $0x4] sm:$0xf] }
  0xaf   : > { %277 = vst [vmem:[%s260_s22] sm:$0xf] %v276_v19  ;;  %279 = vst [vmem:[%s260_s22 + $0x8] sm:$0xf] %v278_v20 }
  0xb0 PF: > { %p10_p10 = scmp.ge.s32.totalorder %s475_s16, 4   ;;  %s535_s12 = smov %s431_s13 }
  0xb1   : > { %s536_s13 = smov %s486_s19  ;;  %s537_s14 = smov %s475_s16 }
  0xb2   :  { %12 = sbr.rel (!%p10_p10) target bundleno = 2 (0x2), region = 149 }

</bundles_post_ra>
